<compile_context>
chip_gen: v6e
topology: v6e:2x2x1
jax: 0.10.0
libtpu: 0.0.40
codegen_flags: <defaults>
</compile_context>

<pallas_src>
import jax
import jax.numpy as jnp
from jax.experimental import pallas as pl
from jax.experimental.pallas import tpu as pltpu


# ---------------------------------------------------------------------------
# small helpers
# ---------------------------------------------------------------------------

def _round_up(x, m):
    return ((x + m - 1) // m) * m


def _pick_row_tile(m, tm_max=1024):
    # multiple of 8 sublanes, no bigger than needed, capped by tm_max
    return min(tm_max, _round_up(m, 8))


def _pad_rows(x2d, m_pad):
    m = x2d.shape[0]
    if m_pad == m:
        return x2d
    return jnp.pad(x2d, ((0, m_pad - m), (0, 0)))


_COMPILER_PARAMS = pltpu.CompilerParams(
    dimension_semantics=("parallel",),
    vmem_limit_bytes=32 * 1024 * 1024,   # safe on v5e/v6e (128 MiB) and v7x (64 MiB)
)


# ---------------------------------------------------------------------------
# kernel 1: senders / receivers  (sr^T @ objects, rr^T @ objects), fused per batch
# ---------------------------------------------------------------------------

def _senders_receivers_kernel(srt_ref, rrt_ref, obj_ref, s_ref, r_ref):
    obj = obj_ref[0]                                                     # [N_obj, D]
    s = jnp.dot(srt_ref[0], obj, preferred_element_type=jnp.float32)     # [N_rel, D]
    r = jnp.dot(rrt_ref[0], obj, preferred_element_type=jnp.float32)
    s_ref[0] = s.astype(s_ref.dtype)
    r_ref[0] = r.astype(r_ref.dtype)


def _senders_receivers(sr_t, rr_t, objects, out_dtype):
    B, R, O = sr_t.shape
    D = objects.shape[-1]
    return pl.pallas_call(
        _senders_receivers_kernel,
        out_shape=(jax.ShapeDtypeStruct((B, R, D), out_dtype),
                   jax.ShapeDtypeStruct((B, R, D), out_dtype)),
        grid_spec=pltpu.PrefetchScalarGridSpec(
            num_scalar_prefetch=0,
            grid=(B,),
            in_specs=[
                pl.BlockSpec((1, R, O), lambda b: (b, 0, 0)),
                pl.BlockSpec((1, R, O), lambda b: (b, 0, 0)),
                pl.BlockSpec((1, O, D), lambda b: (b, 0, 0)),
            ],
            out_specs=(
                pl.BlockSpec((1, R, D), lambda b: (b, 0, 0)),
                pl.BlockSpec((1, R, D), lambda b: (b, 0, 0)),
            ),
        ),
        compiler_params=_COMPILER_PARAMS,
    )(sr_t, rr_t, objects)


# ---------------------------------------------------------------------------
# kernel 2: plain batched matmul (effect_receivers = receiver_relations @ effects)
# ---------------------------------------------------------------------------

def _bmm_kernel(a_ref, b_ref, o_ref):
    o_ref[0] = jnp.dot(a_ref[0], b_ref[0],
                       preferred_element_type=jnp.float32).astype(o_ref.dtype)


def _bmm(a, b, out_dtype):
    B, M, K = a.shape
    N = b.shape[-1]
    return pl.pallas_call(
        _bmm_kernel,
        out_shape=jax.ShapeDtypeStruct((B, M, N), out_dtype),
        grid_spec=pltpu.PrefetchScalarGridSpec(
            num_scalar_prefetch=0,
            grid=(B,),
            in_specs=[pl.BlockSpec((1, M, K), lambda i: (i, 0, 0)),
                      pl.BlockSpec((1, K, N), lambda i: (i, 0, 0))],
            out_specs=pl.BlockSpec((1, M, N), lambda i: (i, 0, 0)),
        ),
        compiler_params=_COMPILER_PARAMS,
    )(a, b)


# ---------------------------------------------------------------------------
# kernel 3: RelationalModel MLP (4x Linear+ReLU), row-tiled, concat fused as
#           split-weight matmuls
# ---------------------------------------------------------------------------

def _relational_mlp_kernel(s_ref, r_ref, ri_ref,
                           w1s_ref, w1r_ref, w1ri_ref, b1_ref,
                           w2_ref, b2_ref, w3_ref, b3_ref,
                           w4_ref, b4_ref, o_ref):
    f32 = jnp.float32
    h = jnp.dot(s_ref[...], w1s_ref[...], preferred_element_type=f32)
    h = h + jnp.dot(r_ref[...], w1r_ref[...], preferred_element_type=f32)
    h = h + jnp.dot(ri_ref[...], w1ri_ref[...], preferred_element_type=f32)
    h = jnp.maximum(h + b1_ref[...], 0.0)
    h = jnp.maximum(
        jnp.dot(h.astype(w2_ref.dtype), w2_ref[...],
                preferred_element_type=f32) + b2_ref[...], 0.0)
    h = jnp.maximum(
        jnp.dot(h.astype(w3_ref.dtype), w3_ref[...],
                preferred_element_type=f32) + b3_ref[...], 0.0)
    h = jnp.maximum(
        jnp.dot(h.astype(w4_ref.dtype), w4_ref[...],
                preferred_element_type=f32) + b4_ref[...], 0.0)
    o_ref[...] = h.astype(o_ref.dtype)


def _relational_model(senders2d, receivers2d, relinfo2d, p, out_dtype, tm_max=1024):
    M, od = senders2d.shape
    rd = relinfo2d.shape[1]
    H = p["rw1"].shape[1]
    E = p["rw4"].shape[1]
    cd = senders2d.dtype

    tm = _pick_row_tile(M, tm_max)
    m_pad = _round_up(M, tm)
    s2 = _pad_rows(senders2d, m_pad)
    r2 = _pad_rows(receivers2d, m_pad)
    ri2 = _pad_rows(relinfo2d, m_pad)

    w1 = p["rw1"].astype(cd)
    w1s, w1r, w1ri = w1[:od], w1[od:2 * od], w1[2 * od:]
    b1 = p["rb1"].astype(jnp.float32).reshape(1, H)
    w2 = p["rw2"].astype(cd)
    b2 = p["rb2"].astype(jnp.float32).reshape(1, H)
    w3 = p["rw3"].astype(cd)
    b3 = p["rb3"].astype(jnp.float32).reshape(1, H)
    w4 = p["rw4"].astype(cd)
    b4 = p["rb4"].astype(jnp.float32).reshape(1, E)

    const = lambda i: (0, 0)   # weights/biases: resident across row tiles
    row = lambda i: (i, 0)     # activations: tiled over rows

    out = pl.pallas_call(
        _relational_mlp_kernel,
        out_shape=jax.ShapeDtypeStruct((m_pad, E), out_dtype),
        grid_spec=pltpu.PrefetchScalarGridSpec(
            num_scalar_prefetch=0,
            grid=(m_pad // tm,),
            in_specs=[
                pl.BlockSpec((tm, od), row),
                pl.BlockSpec((tm, od), row),
                pl.BlockSpec((tm, rd), row),
                pl.BlockSpec((od, H), const),
                pl.BlockSpec((od, H), const),
                pl.BlockSpec((rd, H), const),
                pl.BlockSpec((1, H), const),
                pl.BlockSpec((H, H), const),
                pl.BlockSpec((1, H), const),
                pl.BlockSpec((H, H), const),
                pl.BlockSpec((1, H), const),
                pl.BlockSpec((H, E), const),
                pl.BlockSpec((1, E), const),
            ],
            out_specs=pl.BlockSpec((tm, E), row),
        ),
        compiler_params=_COMPILER_PARAMS,
    )(s2, r2, ri2, w1s, w1r, w1ri, b1, w2, b2, w3, b3, w4, b4)
    return out[:M]


# ---------------------------------------------------------------------------
# kernel 4: ObjectModel MLP (Linear->ReLU->Linear) + sigmoid, row-tiled
# ---------------------------------------------------------------------------

def _object_mlp_kernel(ob_ref, er_ref, w1o_ref, w1e_ref, b1_ref,
                       w2_ref, b2_ref, o_ref):
    f32 = jnp.float32
    h = jnp.dot(ob_ref[...], w1o_ref[...], preferred_element_type=f32)
    h = h + jnp.dot(er_ref[...], w1e_ref[...], preferred_element_type=f32)
    h = jnp.maximum(h + b1_ref[...], 0.0)
    # Output width 1: VPU multiply + lane reduction instead of a 1-lane MXU matmul.
    y = jnp.sum(h * w2_ref[...], axis=-1, keepdims=True) + b2_ref[0]
    y = 1.0 / (1.0 + jnp.exp(-y))          # sigmoid (EUP exp + reciprocal)
    o_ref[...] = y.astype(o_ref.dtype)


def _object_model(objects2d, effrecv2d, p, tm_max=1024):
    M, od = objects2d.shape
    ed = effrecv2d.shape[1]
    H = p["ow1"].shape[1]
    cd = objects2d.dtype

    tm = _pick_row_tile(M, tm_max)
    m_pad = _round_up(M, tm)
    ob2 = _pad_rows(objects2d, m_pad)
    er2 = _pad_rows(effrecv2d, m_pad)

    w1 = p["ow1"].astype(cd)
    w1o, w1e = w1[:od], w1[od:]
    b1 = p["ob1"].astype(jnp.float32).reshape(1, H)
    w2 = p["ow2"].astype(jnp.float32).reshape(1, H)   # f32 row for the VPU reduce
    b2 = p["ob2"].astype(jnp.float32).reshape(1,)     # scalar -> SMEM

    const = lambda i: (0, 0)
    row = lambda i: (i, 0)

    out = pl.pallas_call(
        _object_mlp_kernel,
        out_shape=jax.ShapeDtypeStruct((m_pad, 1), jnp.float32),
        grid_spec=pltpu.PrefetchScalarGridSpec(
            num_scalar_prefetch=0,
            grid=(m_pad // tm,),
            in_specs=[
                pl.BlockSpec((tm, od), row),
                pl.BlockSpec((tm, ed), row),
                pl.BlockSpec((od, H), const),
                pl.BlockSpec((ed, H), const),
                pl.BlockSpec((1, H), const),
                pl.BlockSpec((1, H), const),
                pl.BlockSpec(memory_space=pltpu.MemorySpace.SMEM),  # b2 scalar
            ],
            out_specs=pl.BlockSpec((tm, 1), row),
        ),
        compiler_params=_COMPILER_PARAMS,
    )(ob2, er2, w1o, w1e, b1, w2, b2)
    return out[:M]


# ---------------------------------------------------------------------------
# full InteractionNetwork forward
# ---------------------------------------------------------------------------

def interaction_network_forward(objects, sender_relations, receiver_relations,
                                relation_info, params, *,
                                compute_dtype=jnp.bfloat16, tm_max=1024):
    """objects: [B, N_obj, object_dim]
       sender_relations / receiver_relations: [B, N_obj, N_rel]
       relation_info: [B, N_rel, relation_dim]
       returns sigmoid logits: [B * N_obj, 1] (float32)"""
    cd = compute_dtype
    B, n_obj, od = objects.shape
    n_rel, rd = relation_info.shape[1], relation_info.shape[2]
    ed = params["rw4"].shape[1]

    obj_c = objects.astype(cd)
    sr_t = jnp.swapaxes(sender_relations, 1, 2).astype(cd)     # [B, N_rel, N_obj]
    rr_t = jnp.swapaxes(receiver_relations, 1, 2).astype(cd)
    rr_c = receiver_relations.astype(cd)
    ri_c = relation_info.astype(cd)

    # senders = sr^T @ objects ; receivers = rr^T @ objects (objects read once)
    senders, receivers = _senders_receivers(sr_t, rr_t, obj_c, cd)

    # RelationalModel over B*N_rel rows (concat fused via split weights)
    s2d = senders.reshape(B * n_rel, od)
    r2d = receivers.reshape(B * n_rel, od)
    ri2d = ri_c.reshape(B * n_rel, rd)
    effects2d = _relational_model(s2d, r2d, ri2d, params, cd, tm_max)
    effects = effects2d.reshape(B, n_rel, ed)

    # effect_receivers = receiver_relations @ effects
    effect_receivers = _bmm(rr_c, effects, cd)

    # ObjectModel + sigmoid over B*N_obj rows
    ob2d = obj_c.reshape(B * n_obj, od)
    er2d = effect_receivers.reshape(B * n_obj, ed)
    return _object_model(ob2d, er2d, params, tm_max)


# ---------------------------------------------------------------------------
# pure-JAX reference (mirrors the kernel's dtype handling)
# ---------------------------------------------------------------------------

def interaction_network_reference(objects, sender_relations, receiver_relations,
                                  relation_info, params, compute_dtype=jnp.bfloat16):
    cd = compute_dtype
    f32 = jnp.float32

    def lin(x, w, b):
        return jnp.dot(x.astype(cd), w.astype(cd),
                       preferred_element_type=f32) + b.astype(f32)

    obj_c = objects.astype(cd)
    senders = jnp.einsum("bor,bod->brd", sender_relations.astype(cd), obj_c,
                         preferred_element_type=f32).astype(cd)
    receivers = jnp.einsum("bor,bod->brd", receiver_relations.astype(cd), obj_c,
                           preferred_element_type=f32).astype(cd)
    x = jnp.concatenate([senders, receivers, relation_info.astype(cd)], axis=2)
    B, R, _ = x.shape
    x = x.reshape(B * R, -1)
    h = jnp.maximum(lin(x, params["rw1"], params["rb1"]), 0.0)
    h = jnp.maximum(lin(h, params["rw2"], params["rb2"]), 0.0)
    h = jnp.maximum(lin(h, params["rw3"], params["rb3"]), 0.0)
    h = jnp.maximum(lin(h, params["rw4"], params["rb4"]), 0.0)
    effects = h.astype(cd).reshape(B, R, -1)
    er = jnp.einsum("bor,brd->bod", receiver_relations.astype(cd), effects,
                    preferred_element_type=f32).astype(cd)
    xo = jnp.concatenate([obj_c, er], axis=2)
    N = objects.shape[1]
    xo = xo.reshape(B * N, -1)
    h = jnp.maximum(lin(xo, params["ow1"], params["ob1"]), 0.0)
    y = jnp.sum(h * params["ow2"].reshape(1, -1).astype(f32),
                axis=-1, keepdims=True) + params["ob2"].astype(f32)
    return jax.nn.sigmoid(y)


# ---------------------------------------------------------------------------
# demo
# ---------------------------------------------------------------------------

if __name__ == "__main__":
    B, n_obj = 2, 8
    n_rel = n_obj * (n_obj - 1)          # 56 directed relations
    object_dim, relation_dim, effect_dim = 8, 4, 16
    rel_hidden, obj_hidden = 150, 100    # fixed by the module

    key = jax.random.PRNGKey(0)
    keys = jax.random.split(key, 16)

    objects = jax.random.normal(keys[0], (B, n_obj, object_dim), dtype=jnp.float32)
    relation_info = jax.random.normal(keys[1], (B, n_rel, relation_dim), dtype=jnp.float32)

    # one-hot sender / receiver incidence matrices: [B, n_obj, n_rel]
    snd_idx = jax.random.randint(keys[2], (B, n_rel), 0, n_obj)
    rcv_idx = jax.random.randint(keys[3], (B, n_rel), 0, n_obj)
    sender_relations = jax.nn.one_hot(snd_idx, n_obj, dtype=jnp.float32).transpose(0, 2, 1)
    receiver_relations = jax.nn.one_hot(rcv_idx, n_obj, dtype=jnp.float32).transpose(0, 2, 1)

    def linear_init(kw, kb, fan_in, fan_out):
        bound = 1.0 / (fan_in ** 0.5)
        w = jax.random.uniform(kw, (fan_in, fan_out), minval=-bound, maxval=bound,
                               dtype=jnp.float32)
        b = jax.random.uniform(kb, (fan_out,), minval=-bound, maxval=bound,
                               dtype=jnp.float32)
        return w, b

    rel_in = 2 * object_dim + relation_dim
    obj_in = object_dim + effect_dim
    params = {}
    params["rw1"], params["rb1"] = linear_init(keys[4], keys[5], rel_in, rel_hidden)
    params["rw2"], params["rb2"] = linear_init(keys[6], keys[7], rel_hidden, rel_hidden)
    params["rw3"], params["rb3"] = linear_init(keys[8], keys[9], rel_hidden, rel_hidden)
    params["rw4"], params["rb4"] = linear_init(keys[10], keys[11], rel_hidden, effect_dim)
    params["ow1"], params["ob1"] = linear_init(keys[12], keys[13], obj_in, obj_hidden)
    params["ow2"], params["ob2"] = linear_init(keys[14], keys[15], obj_hidden, 1)

    out = interaction_network_forward(objects, sender_relations, receiver_relations,
                                      relation_info, params)
    out = jax.block_until_ready(out)

    ref = interaction_network_reference(objects, sender_relations, receiver_relations,
                                        relation_info, params)
    assert out.shape == (B * n_obj, 1), out.shape
    assert jnp.allclose(out, ref, atol=1e-2, rtol=1e-2), \
        float(jnp.max(jnp.abs(out - ref)))

    print("KERNEL_OK")
</pallas_src>

<mosaic_0001>
module attributes {stable_mosaic.version = 11 : i64} {
  func.func @_senders_receivers_kernel(%arg0: i32, %arg1: memref<1x56x8xbf16, #tpu.memory_space<vmem>>, %arg2: memref<1x56x8xbf16, #tpu.memory_space<vmem>>, %arg3: memref<1x8x8xbf16, #tpu.memory_space<vmem>>, %arg4: memref<1x56x8xbf16, #tpu.memory_space<vmem>>, %arg5: memref<1x56x8xbf16, #tpu.memory_space<vmem>>) attributes {dimension_semantics = [#tpu.dimension_semantics<parallel>], iteration_bounds = array<i64: 2>, scalar_prefetch = 0 : i64, scratch_operands = 0 : i64, tpu.core_type = #tpu.core_type<tc>, window_params = [{transform_indices = @transform_0, window_bounds = array<i64: 1, 56, 8>}, {transform_indices = @transform_1, window_bounds = array<i64: 1, 56, 8>}, {transform_indices = @transform_2, window_bounds = array<i64: 1, 8, 8>}, {transform_indices = @transform_3, window_bounds = array<i64: 1, 56, 8>}, {transform_indices = @transform_4, window_bounds = array<i64: 1, 56, 8>}]} {
    %c0 = arith.constant 0 : index
    %c0_0 = arith.constant 0 : index
    %c0_1 = arith.constant 0 : index
    %0 = vector.load %arg3[%c0, %c0_0, %c0_1] : memref<1x8x8xbf16, #tpu.memory_space<vmem>>, vector<1x8x8xbf16>
    %1 = vector.shape_cast %0 : vector<1x8x8xbf16> to vector<8x8xbf16>
    %c0_2 = arith.constant 0 : index
    %c0_3 = arith.constant 0 : index
    %c0_4 = arith.constant 0 : index
    %2 = vector.load %arg1[%c0_2, %c0_3, %c0_4] : memref<1x56x8xbf16, #tpu.memory_space<vmem>>, vector<1x56x8xbf16>
    %3 = vector.shape_cast %2 : vector<1x56x8xbf16> to vector<56x8xbf16>
    %cst = arith.constant dense<0.000000e+00> : vector<56x8xf32>
    %4 = tpu.matmul %3, %1, %cst {dimension_numbers = #tpu.dot_dimension_numbers<[1], [0], [0], [1], [0, 0, 1, 1], [], []>} : vector<56x8xbf16>, vector<8x8xbf16>, vector<56x8xf32> -> vector<56x8xf32>
    %c0_5 = arith.constant 0 : index
    %c0_6 = arith.constant 0 : index
    %c0_7 = arith.constant 0 : index
    %5 = vector.load %arg2[%c0_5, %c0_6, %c0_7] : memref<1x56x8xbf16, #tpu.memory_space<vmem>>, vector<1x56x8xbf16>
    %6 = vector.shape_cast %5 : vector<1x56x8xbf16> to vector<56x8xbf16>
    %cst_8 = arith.constant dense<0.000000e+00> : vector<56x8xf32>
    %7 = tpu.matmul %6, %1, %cst_8 {dimension_numbers = #tpu.dot_dimension_numbers<[1], [0], [0], [1], [0, 0, 1, 1], [], []>} : vector<56x8xbf16>, vector<8x8xbf16>, vector<56x8xf32> -> vector<56x8xf32>
    %8 = arith.truncf %4 : vector<56x8xf32> to vector<56x8xbf16>
    %c0_9 = arith.constant 0 : index
    %c0_10 = arith.constant 0 : index
    %c0_11 = arith.constant 0 : index
    %9 = vector.load %arg4[%c0_9, %c0_10, %c0_11] : memref<1x56x8xbf16, #tpu.memory_space<vmem>>, vector<1x56x8xbf16>
    %10 = vector.shape_cast %9 : vector<1x56x8xbf16> to vector<56x8xbf16>
    %11 = vector.shape_cast %8 : vector<56x8xbf16> to vector<1x56x8xbf16>
    tpu.vector_store %arg4[%c0_9, %c0_10, %c0_11], %11 {strides = array<i32>} : memref<1x56x8xbf16, #tpu.memory_space<vmem>>, vector<1x56x8xbf16>,
    %12 = arith.truncf %7 : vector<56x8xf32> to vector<56x8xbf16>
    %c0_12 = arith.constant 0 : index
    %c0_13 = arith.constant 0 : index
    %c0_14 = arith.constant 0 : index
    %13 = vector.load %arg5[%c0_12, %c0_13, %c0_14] : memref<1x56x8xbf16, #tpu.memory_space<vmem>>, vector<1x56x8xbf16>
    %14 = vector.shape_cast %13 : vector<1x56x8xbf16> to vector<56x8xbf16>
    %15 = vector.shape_cast %12 : vector<56x8xbf16> to vector<1x56x8xbf16>
    tpu.vector_store %arg5[%c0_12, %c0_13, %c0_14], %15 {strides = array<i32>} : memref<1x56x8xbf16, #tpu.memory_space<vmem>>, vector<1x56x8xbf16>,
    return
  }
  func.func @transform_0(%arg0: i32) -> (i32, i32, i32) {
    %c0_i32 = arith.constant 0 : i32
    %c0_i32_0 = arith.constant 0 : i32
    %c0_i32_1 = arith.constant 0 : i32
    return %arg0, %c0_i32, %c0_i32_0 : i32, i32, i32
  }
  func.func @transform_1(%arg0: i32) -> (i32, i32, i32) {
    %c0_i32 = arith.constant 0 : i32
    %c0_i32_0 = arith.constant 0 : i32
    %c0_i32_1 = arith.constant 0 : i32
    return %arg0, %c0_i32, %c0_i32_0 : i32, i32, i32
  }
  func.func @transform_2(%arg0: i32) -> (i32, i32, i32) {
    %c0_i32 = arith.constant 0 : i32
    %c0_i32_0 = arith.constant 0 : i32
    %c0_i32_1 = arith.constant 0 : i32
    return %arg0, %c0_i32, %c0_i32_0 : i32, i32, i32
  }
  func.func @transform_3(%arg0: i32) -> (i32, i32, i32) {
    %c0_i32 = arith.constant 0 : i32
    %c0_i32_0 = arith.constant 0 : i32
    %c0_i32_1 = arith.constant 0 : i32
    return %arg0, %c0_i32, %c0_i32_0 : i32, i32, i32
  }
  func.func @transform_4(%arg0: i32) -> (i32, i32, i32) {
    %c0_i32 = arith.constant 0 : i32
    %c0_i32_0 = arith.constant 0 : i32
    %c0_i32_1 = arith.constant 0 : i32
    return %arg0, %c0_i32, %c0_i32_0 : i32, i32, i32
  }
}

</mosaic_0001>

<bundles_post_ra>
// kernel: tpu_custom_call.1
= control target key start
LH: loop header
LB: loop body
LE: loop exit
PB: predicated region body
PF: predicated region fallthrough
CT: control target
= control target key end

     0   :  { %s780_s15 = smov 0   ;;  %s852_s0 = inlined_call_operand.vmem [shape: bf16[2,56,8], index: 0, kind: input, shape index: {}]   ;;  %s853_s1 = inlined_call_operand.vmem [shape: bf16[2,56,8], index: 1, kind: input, shape index: {}]   ;;  %s854_s2 = inlined_call_operand.vmem [shape: bf16[2,8,8], index: 2, kind: input, shape index: {}]   ;;  %s855_s3 = inlined_call_operand.vmem [shape: bf16[2,56,8], index: 3, kind: output, shape index: {0}]   ;;  %s856_s4 = inlined_call_operand.vmem [shape: bf16[2,56,8], index: 4, kind: output, shape index: {1}]  }
   0x1 LB: > { %s642_s16 = sadd.s32 4294967295, %s753_s15   ;;  %p646_p0 = scmp.ge.s32.totalorder %s753_s15, 1  ;;  %s753_s15 = sphi %s780_s15, %s15_s15  }
   0x2   : > { %p184_p1 = scmp.lt.s32.totalorder %s753_s15, 3 }
   0x4   : > { %p185_p2 = pnand %p646_p0, %p184_p1 }
   0x5   : > { %p224_p3 = scmp.lt.s32.totalorder (!%p185_p2), %s642_s16, 1 }
   0x6   : > { %188 = sbr.rel (%p185_p2) target bundleno = 229 (0xe5), region = 32 }
   0xb   : > { %s858_s16 = smov (!%p224_p3, %s642_s16), 1  ;;  %vm288_vm0 = vcmask 1043456   ;;  %vm275_vm1 = vcmask 64512   ;;  %vm486_vm2 = vcmask 60416  }
   0xc   : > { %s788_s17 = smul.u32 28, %s858_s16  ;;  %s649_s18 = sshll.u32 %s858_s16, 2 }
   0xd   : > { %s237_s21 = scalar_lea.vmem %s854_s2, %s649_s18 }
   0xe   : > { %s228_s24 = scalar_lea.vmem %s852_s0, %s788_s17  ;;  %s233_s27 = scalar_lea.vmem %s853_s1, %s788_s17  ;;  %v249_v0 = vld [vmem:[%s237_s21] sm:$0xf] }
   0xf   : > { %728 = vmatprep.subr.msk.bf16.mxu0 %vm288_vm0, %v249_v0  ;;  %729 = vmatprep.subr.msk.bf16.mxu1 %vm288_vm0, %v249_v0  ;;  %v290_v1 = vsel %vm288_vm0, %v249_v0, 0  ;;  %v739_v2 = vld [vmem:[%s228_s24] sm:$0xff]   ;;  %v741_v4 = vld [vmem:[%s228_s24 + $0x8] sm:$0xff]   ;;  %v743_v6 = vld [vmem:[%s228_s24 + $0x10] sm:$0xff]   ;;  %s813_s30 = scalar_lea.vmem %s855_s3, %s788_s17  ;;  %s819_s7 = scalar_lea.vmem %s856_s4, %s788_s17 }
  0x10   : > { %709 = vmatpush3.bf16.msra.mxu0 %v290_v1  ;;  %719 = vmatpush3.bf16.msra.mxu1 %v290_v1  ;;  %v740_v3 = vld [vmem:[%s233_s27] sm:$0xff]   ;;  %v742_v5 = vld [vmem:[%s233_s27 + $0x8] sm:$0xff]   ;;  %v744_v7 = vld [vmem:[%s233_s27 + $0x10] sm:$0xff]  }
  0x11   : > { %710 = vmatprep.mubr.msk.bf16.mxu0 %vm275_vm1, %v739_v2  ;;  %720 = vmatprep.mubr.msk.bf16.mxu1 %vm275_vm1, %v740_v3  ;;  %v745_v8 = vld [vmem:[%s228_s24 + $0x18] ss:$0 sps:$4 sm:$0xff]  }
  0x12   : > { %v746_v9 = vld [vmem:[%s233_s27 + $0x18] ss:$0 sps:$4 sm:$0xff]  }
  0x13   : > { %711 = vmatmul.mubr.msk.bf16.vlgmr.msra.gmra.mxu0 %vm275_vm1, %v741_v4  ;;  %721 = vmatmul.mubr.msk.bf16.vlgmr.msra.gmra.mxu1 %vm275_vm1, %v742_v5 }
  0x14   : > { %714 = vmatprep.mubr.msk.bf16.mxu0 %vm275_vm1, %v743_v6  ;;  %724 = vmatprep.mubr.msk.bf16.mxu1 %vm275_vm1, %v744_v7 }
  0x1b   : > { %715 = vmatmul.mubr.msk.bf16.gmra.mxu0 %vm275_vm1, %v745_v8  ;;  %725 = vmatmul.mubr.msk.bf16.gmra.mxu1 %vm275_vm1, %v746_v9 }
  0xd3   : > { %v712_v10 = vpop.f32.mrf.mxu0  ;;  %v722_v12 = vpop.f32.mrf.mxu1 }
  0xd4   : > { %v686_v11 = vpack.c.bf16 %v712_v10, %v712_v10  ;;  %v693_v13 = vpack.c.bf16 %v722_v12, %v722_v12 }
  0xd5   : > { %v326_v14 = vpop.f32.mrf.mxu0  ;;  %v427_v16 = vpop.f32.mrf.mxu1 }
  0xd6   : > { %489 = vst.msk [vmem:[%s813_s30 + $0x8] sm:$0xf] %vm486_vm2, %v686_v11  ;;  %v684_v15 = vpack.c.bf16 %v326_v14, %v326_v14  ;;  %525 = vst.msk [vmem:[%s819_s7 + $0x8] sm:$0xf] %vm486_vm2, %v693_v13  ;;  %v691_v17 = vpack.c.bf16 %v427_v16, %v427_v16 }
  0xd7   : > { %v713_v18 = vpop.f32.mrf.mxu0  ;;  %v723_v20 = vpop.f32.mrf.mxu1 }
  0xd8   : > { %487 = vst.msk [vmem:[%s813_s30] sm:$0xf] %vm486_vm2, %v684_v15  ;;  %v687_v19 = vpack.c.bf16 %v713_v18, %v713_v18  ;;  %523 = vst.msk [vmem:[%s819_s7] sm:$0xf] %vm486_vm2, %v691_v17  ;;  %v694_v21 = vpack.c.bf16 %v723_v20, %v723_v20 }
  0xd9   : > { %v329_v22 = vpop.f32.mrf.mxu0  ;;  %v430_v24 = vpop.f32.mrf.mxu1 }
  0xda   : > { %490 = vst.msk [vmem:[%s813_s30 + $0xc] sm:$0xf] %vm486_vm2, %v687_v19  ;;  %v685_v23 = vpack.c.bf16 %v329_v22, %v329_v22  ;;  %526 = vst.msk [vmem:[%s819_s7 + $0xc] sm:$0xf] %vm486_vm2, %v694_v21  ;;  %v692_v25 = vpack.c.bf16 %v430_v24, %v430_v24 }
  0xdb   : > { %v716_v26 = vpop.f32.mrf.mxu0  ;;  %v726_v28 = vpop.f32.mrf.mxu1 }
  0xdc   : > { %488 = vst.msk [vmem:[%s813_s30 + $0x4] sm:$0xf] %vm486_vm2, %v685_v23  ;;  %v690_v27 = vpack.c.bf16 %v716_v26, %v716_v26  ;;  %524 = vst.msk [vmem:[%s819_s7 + $0x4] sm:$0xf] %vm486_vm2, %v692_v25  ;;  %v697_v29 = vpack.c.bf16 %v726_v28, %v726_v28 }
  0xdd   : > { %v342_v30 = vpop.f32.mrf.mxu0  ;;  %v443_v32 = vpop.f32.mrf.mxu1 }
  0xde   : > { %493 = vst.msk [vmem:[%s813_s30 + $0x18] sm:$0xf] %vm486_vm2, %v690_v27  ;;  %v688_v31 = vpack.c.bf16 %v342_v30, %v342_v30  ;;  %529 = vst.msk [vmem:[%s819_s7 + $0x18] sm:$0xf] %vm486_vm2, %v697_v29  ;;  %v695_v33 = vpack.c.bf16 %v443_v32, %v443_v32 }
  0xdf   : > { %v717_v34 = vpop.f32.mrf.mxu0  ;;  %v727_v35 = vpop.f32.mrf.mxu1 }
  0xe0   : > { %491 = vst.msk [vmem:[%s813_s30 + $0x10] sm:$0xf] %vm486_vm2, %v688_v31  ;;  %527 = vst.msk [vmem:[%s819_s7 + $0x10] sm:$0xf] %vm486_vm2, %v695_v33 }
  0xe1   : > { %v345_v36 = vpop.f32.mrf.mxu0  ;;  %v446_v38 = vpop.f32.mrf.mxu1 }
  0xe2   : > { %v689_v37 = vpack.c.bf16 %v345_v36, %v345_v36  ;;  %v696_v39 = vpack.c.bf16 %v446_v38, %v446_v38 }
  0xe4   : > { %492 = vst.msk [vmem:[%s813_s30 + $0x14] sm:$0xf] %vm486_vm2, %v689_v37  ;;  %528 = vst.msk [vmem:[%s819_s7 + $0x14] sm:$0xf] %vm486_vm2, %v696_v39 }
  0xe5 PF: > { %s15_s15 = sadd.s32 1, %s753_s15  }
  0xe6   : > { %p12_p4 = scmp.ge.s32.totalorder %s15_s15, 4  }
  0xe8   :  { %14 = sbr.rel (!%p12_p4) target bundleno = 1 (0x1), region = 80 }

</bundles_post_ra>
